<compile_context>
chip_gen: v7x
topology: tpu7x:2x2x1
jax: 0.10.0
libtpu: 0.0.40
codegen_flags: <defaults>
</compile_context>

<pallas_src>
import functools

import jax
import jax.numpy as jnp
from jax import lax
from jax.experimental import pallas as pl
from jax.experimental.pallas import tpu as pltpu


def _round_up(x, m):
    return (x + m - 1) // m * m


def _estimate_vmem(tb, *, L_in, L, S, H, c_bytes, out_bytes, scaler, res_bufs=1):
    """Rough per-call VMEM footprint (bytes) for a batch tile of `tb` rows."""
    k_aug = S * L + S
    lane_in = max(L_in, 128)
    tiled = 2 * tb * (L_in + S) * 4                    # u + onehot blocks, double-buffered f32
    outb = 2 * tb * L_in * out_bytes                   # output block, double-buffered
    scratch = tb * _round_up(k_aug, 128) * c_bytes     # in-kernel xu operand
    live = 3 * tb * lane_in * 4                        # delta / residual f32 temporaries
    res = _round_up(k_aug, 8) * lane_in * c_bytes      # [amat_flat ; offsets]
    if scaler:
        lane_h = max(_round_up(H, 128), 128)
        res += (_round_up(L, 8) + _round_up(S, 8)) * lane_h * c_bytes   # W1 halves
        res += 8 * lane_h * 4                                           # b1 / gamma / beta
        res += _round_up(H, 8) * 128 * c_bytes                          # W2 (lane-padded)
        live += 2 * tb * lane_h * 4
    return tiled + outb + scratch + live + res_bufs * res


def _pick_batch_tile(B, est_fn, vmem_budget_bytes):
    """Largest multiple-of-8 batch tile within the VMEM budget.  Prefers tiles
    dividing B (no wrapper pad/slice) and keeps >= 2 grid steps when B allows
    so dimension_semantics=("parallel",) can occupy both v7x TensorCores."""
    b_ceil = _round_up(max(B, 1), 8)
    cands = [tb for tb in (1024, 512, 256, 128, 64, 32, 16, 8)
             if tb <= b_ceil and est_fn(tb) <= vmem_budget_bytes]
    if not cands:
        cands = [8]
    if B >= 16:
        cap = _round_up(-(-B // 2), 8)                 # at least two grid steps
        capped = [tb for tb in cands if tb <= cap]
        if capped:
            cands = capped
    for tb in cands:                                   # prefer a divisor of B
        if B % tb == 0:
            return tb
    return cands[0]


def _decoder_kernel(L, S, ln_eps, use_scaler, approx_recip, *refs):
    if use_scaler:
        (u_ref, oh_ref, amat_ref, w1u_ref, w1s_ref, b1gb_ref, w2_ref, b2_ref,
         o_ref, xu_ref) = refs
    else:
        u_ref, oh_ref, amat_ref, o_ref, xu_ref = refs

    oh_f32 = oh_ref[...]                         # (TB, S) f32 — VPU math stays f32
    u_lat = u_ref[:, :L]                         # (TB, L) latent columns (L_in may be padded)
    cdtype = xu_ref.dtype

    # Expanded MXU operand built in VMEM (never touches HBM):
    #   xu[b, s*L + l] = onehot[b, s] * u[b, l]   -> z2 = u @ amat[sample_id]
    #   xu[b, S*L + s] = onehot[b, s]             -> + offsets[sample_id]
    for s in range(S):                           # S is small and static
        xu_ref[:, s * L:(s + 1) * L] = (oh_f32[:, s:s + 1] * u_lat).astype(cdtype)
    xu_ref[:, S * L:S * L + S] = oh_f32.astype(cdtype)

    # delta = z2 + offsets[sample_id] as a single MXU contraction.
    delta = jnp.dot(xu_ref[...], amat_ref[...],
                    preferred_element_type=jnp.float32)          # (TB, L_in) f32

    if use_scaler:
        # Linear(L + S, H): cat([u, onehot]) @ W1 + b1, split into two dots.
        h = (jnp.dot(u_lat.astype(w1u_ref.dtype), w1u_ref[...],
                     preferred_element_type=jnp.float32)
             + jnp.dot(oh_f32.astype(w1s_ref.dtype), w1s_ref[...],
                       preferred_element_type=jnp.float32)
             + b1gb_ref[0:1, :])                                  # (TB, H) f32
        # LayerNorm(H) (H is the true hidden size, no padding -> exact mean/var)
        mean = jnp.mean(h, axis=-1, keepdims=True)
        var = jnp.mean((h - mean) ** 2, axis=-1, keepdims=True)
        h = (h - mean) * lax.rsqrt(var + ln_eps)
        h = h * b1gb_ref[1:2, :] + b1gb_ref[2:3, :]
        # ReLU -> Linear(H, 1) -> Sigmoid (EUP approx reciprocal only on the bf16 path)
        h = jnp.maximum(h, 0.0)
        logit = (jnp.dot(h.astype(w2_ref.dtype), w2_ref[...],
                         preferred_element_type=jnp.float32)
                 + b2_ref[0, 0])                                  # (TB, 1)
        scale = pl.reciprocal(1.0 + jnp.exp(-logit), approx=approx_recip)
        delta = delta * scale

    o_ref[...] = (u_ref[...] + delta).astype(o_ref.dtype)


def linear_decoder_uz(u, sample_id, params, *, scaler=True, ln_eps=1e-5,
                      compute_dtype=jnp.bfloat16, out_dtype=None,
                      vmem_budget_bytes=24 * 1024 * 1024):
    amat = params["amat_sample"]                       # (S, L, O)
    offsets = params["offsets"]                        # (S, O)
    S, L, O = amat.shape
    B = u.shape[0]
    assert O == L, "forward requires n_out == n_latent (u + delta)"
    out_dtype = u.dtype if out_dtype is None else out_dtype

    # Lane-dense output: pad O only when it is not already a lane multiple —
    # for aligned O the wrapper pad + trailing slice (extra HBM passes) vanish.
    L_in = O if O % 128 == 0 else _round_up(O, 128)
    pad_o = L_in != O
    K_aug = S * L + S
    c_bytes = jnp.dtype(compute_dtype).itemsize
    H = params["w1"].shape[1] if scaler else 0

    est = functools.partial(_estimate_vmem, L_in=L_in, L=L, S=S, H=H,
                            c_bytes=c_bytes,
                            out_bytes=jnp.dtype(out_dtype).itemsize,
                            scaler=bool(scaler), res_bufs=1)
    TB = _pick_batch_tile(B, est, vmem_budget_bytes)
    B_pad = _round_up(B, TB)
    vmem_limit = int(min(64 * 2**20, max(32 * 2**20, 2 * est(TB))))

    # sample_id -> one-hot (clamped; matches jnp gather semantics for OOB ids).
    sid = jnp.clip(sample_id.reshape(B).astype(jnp.int32), 0, S - 1)
    onehot = (sid[:, None] == jnp.arange(S, dtype=jnp.int32)[None, :]
              ).astype(jnp.float32)                                    # (B, S)
    u_in = u.astype(jnp.float32)
    if pad_o:
        u_in = jnp.pad(u_in, ((0, 0), (0, L_in - O)))
    if B_pad != B:
        u_in = jnp.pad(u_in, ((0, B_pad - B), (0, 0)))
        onehot = jnp.pad(onehot, ((0, B_pad - B), (0, 0)))

    # [amat_flat ; offsets]: one resident operand for the fused delta matmul.
    amat_aug = jnp.concatenate(
        [amat.reshape(S * L, O), offsets], axis=0).astype(jnp.float32)
    if pad_o:
        amat_aug = jnp.pad(amat_aug, ((0, 0), (0, L_in - O)))
    amat_aug = amat_aug.astype(compute_dtype)                          # (K_aug, L_in)

    args = [u_in, onehot, amat_aug]
    if scaler:
        w1 = params["w1"].astype(jnp.float32)                          # (L + S, H)
        w1u = w1[:L].astype(compute_dtype)                             # (L, H)
        w1s = w1[L:].astype(compute_dtype)                             # (S, H)
        b1gb = jnp.zeros((8, H), jnp.float32)                          # rows: b1, gamma, beta
        b1gb = b1gb.at[0].set(params["b1"].astype(jnp.float32))
        b1gb = b1gb.at[1].set(params["ln_gamma"].astype(jnp.float32))
        b1gb = b1gb.at[2].set(params["ln_beta"].astype(jnp.float32))
        w2 = params["w2"].astype(compute_dtype)                        # (H, 1)
        b2 = params["b2"].reshape(1, 1).astype(jnp.float32)            # SMEM scalar
        args += [w1u, w1s, b1gb, w2, b2]

    approx_recip = bool(jnp.dtype(compute_dtype) != jnp.dtype(jnp.float32))
    kernel = functools.partial(_decoder_kernel, L, S, float(ln_eps),
                               bool(scaler), approx_recip)

    def tiled(shape):                                  # batch-tiled over axis 0
        return pl.BlockSpec(shape, lambda i: (i, 0))

    def resident(shape, single_buffer):                # whole array, VMEM-resident
        idx = lambda i: (0,) * len(shape)
        if single_buffer:
            try:  # constant block index -> double-buffering is pure VMEM waste
                return pl.BlockSpec(shape, idx, pipeline_mode=pl.Buffered(1))
            except (TypeError, AttributeError):
                pass
        return pl.BlockSpec(shape, idx)

    def call(single_buffer_residents):
        in_specs = [
            tiled((TB, L_in)),                                         # u (f32)
            tiled((TB, S)),                                            # one-hot(sample_id)
            resident((K_aug, L_in), single_buffer_residents),          # [amat ; offsets]
        ]
        if scaler:
            in_specs += [
                resident((L, H), single_buffer_residents),             # W1 latent rows
                resident((S, H), single_buffer_residents),             # W1 one-hot rows
                resident((8, H), single_buffer_residents),             # b1 / gamma / beta
                resident((H, 1), single_buffer_residents),             # W2
                pl.BlockSpec(memory_space=pltpu.MemorySpace.SMEM),     # b2 scalar
            ]
        return pl.pallas_call(
            kernel,
            out_shape=jax.ShapeDtypeStruct((B_pad, L_in), out_dtype),
            grid_spec=pltpu.PrefetchScalarGridSpec(
                num_scalar_prefetch=0,
                grid=(B_pad // TB,),
                in_specs=in_specs,
                out_specs=tiled((TB, L_in)),
                scratch_shapes=[pltpu.VMEM((TB, K_aug), compute_dtype)],
            ),
            compiler_params=pltpu.CompilerParams(
                dimension_semantics=("parallel",),
                vmem_limit_bytes=vmem_limit),
        )(*args)

    try:
        out = call(True)
    except Exception:  # JAX / Mosaic without Buffered(1) support: default buffering
        out = call(False)

    if pad_o or B_pad != B:
        out = out[:B, :O]
    return out


def _reference(u, sample_id, params, *, scaler=True, ln_eps=1e-5):
    sid = sample_id.reshape(-1).astype(jnp.int32)
    As = params["amat_sample"][sid]                    # (B, L, O)
    z2 = jnp.sum(As * u[..., None], axis=-2)           # (B, O)
    delta = z2 + params["offsets"][sid]
    if scaler:
        S = params["amat_sample"].shape[0]
        oh = jax.nn.one_hot(sid, S, dtype=u.dtype)
        inputs = jnp.concatenate([u, oh], axis=-1)
        h = inputs @ params["w1"] + params["b1"]
        mean = h.mean(-1, keepdims=True)
        var = ((h - mean) ** 2).mean(-1, keepdims=True)
        h = (h - mean) / jnp.sqrt(var + ln_eps)
        h = h * params["ln_gamma"] + params["ln_beta"]
        h = jax.nn.relu(h)
        scale = jax.nn.sigmoid(h @ params["w2"] + params["b2"])
        delta = delta * scale
    return u + delta


if __name__ == "__main__":
    B, L, S, H = 8, 16, 4, 32
    O = L  # n_out == n_latent (required by `u + delta` in the PyTorch forward)

    key = jax.random.PRNGKey(0)
    ks = jax.random.split(key, 8)
    u = jax.random.normal(ks[0], (B, L), jnp.float32)
    sample_id = jax.random.randint(ks[1], (B, 1), 0, S)

    params = dict(
        amat_sample=jax.random.normal(ks[2], (S, L, O), jnp.float32),
        offsets=jax.random.normal(ks[3], (S, O), jnp.float32),
        w1=jax.random.normal(ks[4], (L + S, H), jnp.float32) * 0.2,
        b1=jax.random.normal(ks[5], (H,), jnp.float32) * 0.1,
        ln_gamma=jnp.ones((H,), jnp.float32),
        ln_beta=jnp.zeros((H,), jnp.float32),
        w2=jax.random.normal(ks[6], (H, 1), jnp.float32) * 0.2,
        b2=jnp.zeros((1,), jnp.float32),
    )

    ref = _reference(u, sample_id, params, scaler=True)

    # scaler=True, bf16 MXU path (default)
    out = linear_decoder_uz(u, sample_id, params, scaler=True)
    jax.block_until_ready(out)
    assert jnp.allclose(out, ref, rtol=1e-1, atol=1e-1), "scaler=True bf16 mismatch"

    # scaler=True, f32 compute (exact sigmoid path -> tighter check)
    out_f32 = linear_decoder_uz(u, sample_id, params, scaler=True,
                                compute_dtype=jnp.float32)
    jax.block_until_ready(out_f32)
    assert jnp.allclose(out_f32, ref, rtol=5e-2, atol=5e-2), "scaler=True f32 mismatch"

    # scaler=False (module default), bf16 and f32
    ref_ns = _reference(u, sample_id, params, scaler=False)
    out_ns = linear_decoder_uz(u, sample_id, params, scaler=False)
    jax.block_until_ready(out_ns)
    assert jnp.allclose(out_ns, ref_ns, rtol=1e-1, atol=1e-1), "scaler=False bf16 mismatch"
    out_ns32 = linear_decoder_uz(u, sample_id, params, scaler=False,
                                 compute_dtype=jnp.float32)
    jax.block_until_ready(out_ns32)
    assert jnp.allclose(out_ns32, ref_ns, rtol=1e-3, atol=1e-3), "scaler=False f32 mismatch"

    # Non-divisible batch exercises the pad-to-TB path.
    B2 = 10
    u2 = jax.random.normal(ks[7], (B2, L), jnp.float32)
    sid2 = jax.random.randint(ks[1], (B2, 1), 0, S)
    out2 = linear_decoder_uz(u2, sid2, params, scaler=True, compute_dtype=jnp.float32)
    jax.block_until_ready(out2)
    ref2 = _reference(u2, sid2, params, scaler=True)
    assert out2.shape == (B2, O)
    assert jnp.allclose(out2, ref2, rtol=5e-2, atol=5e-2), "padded-batch mismatch"

    print("KERNEL_OK")
</pallas_src>

<mosaic_0001>
module attributes {stable_mosaic.version = 11 : i64} {
  func.func @_decoder_kernel(%arg0: i32, %arg1: memref<8x128xf32, #tpu.memory_space<vmem>>, %arg2: memref<8x4xf32, #tpu.memory_space<vmem>>, %arg3: memref<68x128xbf16, #tpu.memory_space<vmem>>, %arg4: memref<16x32xbf16, #tpu.memory_space<vmem>>, %arg5: memref<4x32xbf16, #tpu.memory_space<vmem>>, %arg6: memref<8x32xf32, #tpu.memory_space<vmem>>, %arg7: memref<32x1xbf16, #tpu.memory_space<vmem>>, %arg8: memref<1x1xf32, #tpu.memory_space<smem>>, %arg9: memref<8x128xf32, #tpu.memory_space<vmem>>, %arg10: memref<8x68xbf16, #tpu.memory_space<vmem>>) attributes {dimension_semantics = [#tpu.dimension_semantics<parallel>], iteration_bounds = array<i64: 1>, scalar_prefetch = 0 : i64, scratch_operands = 1 : i64, tpu.core_type = #tpu.core_type<tc>, window_params = [{transform_indices = @transform_0, window_bounds = array<i64: 8, 128>}, {transform_indices = @transform_1, window_bounds = array<i64: 8, 4>}, {pipeline_mode = #tpu.pipeline_mode<synchronous>, transform_indices = @transform_2, window_bounds = array<i64: 68, 128>}, {pipeline_mode = #tpu.pipeline_mode<synchronous>, transform_indices = @transform_3, window_bounds = array<i64: 16, 32>}, {pipeline_mode = #tpu.pipeline_mode<synchronous>, transform_indices = @transform_4, window_bounds = array<i64: 4, 32>}, {pipeline_mode = #tpu.pipeline_mode<synchronous>, transform_indices = @transform_5, window_bounds = array<i64: 8, 32>}, {pipeline_mode = #tpu.pipeline_mode<synchronous>, transform_indices = @transform_6, window_bounds = array<i64: 32, 1>}, {transform_indices = @transform_7, window_bounds = array<i64: 1, 1>}, {transform_indices = @transform_8, window_bounds = array<i64: 8, 128>}]} {
    %c0 = arith.constant 0 : index
    %c0_0 = arith.constant 0 : index
    %0 = vector.load %arg2[%c0, %c0_0] : memref<8x4xf32, #tpu.memory_space<vmem>>, vector<8x4xf32>
    %c0_1 = arith.constant 0 : index
    %c0_2 = arith.constant 0 : index
    %1 = vector.load %arg1[%c0_1, %c0_2] : memref<8x128xf32, #tpu.memory_space<vmem>>, vector<8x16xf32>
    %2 = vector.extract_strided_slice %0 {offsets = [0, 0], sizes = [8, 1], strides = [1, 1]} : vector<8x4xf32> to vector<8x1xf32>
    %3 = vector.broadcast %2 : vector<8x1xf32> to vector<8x16xf32>
    %4 = arith.mulf %3, %1 : vector<8x16xf32>
    %5 = arith.truncf %4 : vector<8x16xf32> to vector<8x16xbf16>
    %c0_3 = arith.constant 0 : index
    %c0_4 = arith.constant 0 : index
    %6 = vector.load %arg10[%c0_3, %c0_4] : memref<8x68xbf16, #tpu.memory_space<vmem>>, vector<8x16xbf16>
    tpu.vector_store %arg10[%c0_3, %c0_4], %5 {strides = array<i32>} : memref<8x68xbf16, #tpu.memory_space<vmem>>, vector<8x16xbf16>,
    %7 = vector.extract_strided_slice %0 {offsets = [0, 1], sizes = [8, 1], strides = [1, 1]} : vector<8x4xf32> to vector<8x1xf32>
    %8 = vector.broadcast %7 : vector<8x1xf32> to vector<8x16xf32>
    %9 = arith.mulf %8, %1 : vector<8x16xf32>
    %10 = arith.truncf %9 : vector<8x16xf32> to vector<8x16xbf16>
    %c0_5 = arith.constant 0 : index
    %c16 = arith.constant 16 : index
    %11 = vector.load %arg10[%c0_5, %c16] : memref<8x68xbf16, #tpu.memory_space<vmem>>, vector<8x16xbf16>
    tpu.vector_store %arg10[%c0_5, %c16], %10 {strides = array<i32>} : memref<8x68xbf16, #tpu.memory_space<vmem>>, vector<8x16xbf16>,
    %12 = vector.extract_strided_slice %0 {offsets = [0, 2], sizes = [8, 1], strides = [1, 1]} : vector<8x4xf32> to vector<8x1xf32>
    %13 = vector.broadcast %12 : vector<8x1xf32> to vector<8x16xf32>
    %14 = arith.mulf %13, %1 : vector<8x16xf32>
    %15 = arith.truncf %14 : vector<8x16xf32> to vector<8x16xbf16>
    %c0_6 = arith.constant 0 : index
    %c32 = arith.constant 32 : index
    %16 = vector.load %arg10[%c0_6, %c32] : memref<8x68xbf16, #tpu.memory_space<vmem>>, vector<8x16xbf16>
    tpu.vector_store %arg10[%c0_6, %c32], %15 {strides = array<i32>} : memref<8x68xbf16, #tpu.memory_space<vmem>>, vector<8x16xbf16>,
    %17 = vector.extract_strided_slice %0 {offsets = [0, 3], sizes = [8, 1], strides = [1, 1]} : vector<8x4xf32> to vector<8x1xf32>
    %18 = vector.broadcast %17 : vector<8x1xf32> to vector<8x16xf32>
    %19 = arith.mulf %18, %1 : vector<8x16xf32>
    %20 = arith.truncf %19 : vector<8x16xf32> to vector<8x16xbf16>
    %c0_7 = arith.constant 0 : index
    %c48 = arith.constant 48 : index
    %21 = vector.load %arg10[%c0_7, %c48] : memref<8x68xbf16, #tpu.memory_space<vmem>>, vector<8x16xbf16>
    tpu.vector_store %arg10[%c0_7, %c48], %20 {strides = array<i32>} : memref<8x68xbf16, #tpu.memory_space<vmem>>, vector<8x16xbf16>,
    %22 = arith.truncf %0 : vector<8x4xf32> to vector<8x4xbf16>
    %c0_8 = arith.constant 0 : index
    %c64 = arith.constant 64 : index
    %23 = vector.load %arg10[%c0_8, %c64] : memref<8x68xbf16, #tpu.memory_space<vmem>>, vector<8x4xbf16>
    tpu.vector_store %arg10[%c0_8, %c64], %22 {strides = array<i32>} : memref<8x68xbf16, #tpu.memory_space<vmem>>, vector<8x4xbf16>,
    %c0_9 = arith.constant 0 : index
    %c0_10 = arith.constant 0 : index
    %24 = vector.load %arg10[%c0_9, %c0_10] : memref<8x68xbf16, #tpu.memory_space<vmem>>, vector<8x68xbf16>
    %c0_11 = arith.constant 0 : index
    %c0_12 = arith.constant 0 : index
    %25 = vector.load %arg3[%c0_11, %c0_12] : memref<68x128xbf16, #tpu.memory_space<vmem>>, vector<68x128xbf16>
    %cst = arith.constant dense<0.000000e+00> : vector<8x128xf32>
    %26 = tpu.matmul %24, %25, %cst {dimension_numbers = #tpu.dot_dimension_numbers<[1], [0], [0], [1], [0, 0, 1, 1], [], []>} : vector<8x68xbf16>, vector<68x128xbf16>, vector<8x128xf32> -> vector<8x128xf32>
    %27 = arith.truncf %1 : vector<8x16xf32> to vector<8x16xbf16>
    %c0_13 = arith.constant 0 : index
    %c0_14 = arith.constant 0 : index
    %28 = vector.load %arg4[%c0_13, %c0_14] : memref<16x32xbf16, #tpu.memory_space<vmem>>, vector<16x32xbf16>
    %cst_15 = arith.constant dense<0.000000e+00> : vector<8x32xf32>
    %29 = tpu.matmul %27, %28, %cst_15 {dimension_numbers = #tpu.dot_dimension_numbers<[1], [0], [0], [1], [0, 0, 1, 1], [], []>} : vector<8x16xbf16>, vector<16x32xbf16>, vector<8x32xf32> -> vector<8x32xf32>
    %30 = arith.truncf %0 : vector<8x4xf32> to vector<8x4xbf16>
    %c0_16 = arith.constant 0 : index
    %c0_17 = arith.constant 0 : index
    %31 = vector.load %arg5[%c0_16, %c0_17] : memref<4x32xbf16, #tpu.memory_space<vmem>>, vector<4x32xbf16>
    %cst_18 = arith.constant dense<0.000000e+00> : vector<8x32xf32>
    %32 = tpu.matmul %30, %31, %cst_18 {dimension_numbers = #tpu.dot_dimension_numbers<[1], [0], [0], [1], [0, 0, 1, 1], [], []>} : vector<8x4xbf16>, vector<4x32xbf16>, vector<8x32xf32> -> vector<8x32xf32>
    %33 = arith.addf %29, %32 : vector<8x32xf32>
    %c0_19 = arith.constant 0 : index
    %c0_20 = arith.constant 0 : index
    %34 = vector.load %arg6[%c0_19, %c0_20] : memref<8x32xf32, #tpu.memory_space<vmem>>, vector<1x32xf32>
    %35 = vector.broadcast %34 : vector<1x32xf32> to vector<8x32xf32>
    %36 = arith.addf %33, %35 : vector<8x32xf32>
    %cst_21 = arith.constant dense<0.000000e+00> : vector<8xf32>
    %37 = vector.multi_reduction <add>, %36, %cst_21 [1] : vector<8x32xf32> to vector<8xf32>
    %38 = vector.shape_cast %37 : vector<8xf32> to vector<8x1xf32>
    %cst_22 = arith.constant 3.200000e+01 : f32
    %39 = vector.broadcast %cst_22 : f32 to vector<8x1xf32>
    %40 = arith.divf %38, %39 : vector<8x1xf32>
    %41 = vector.broadcast %40 : vector<8x1xf32> to vector<8x32xf32>
    %42 = arith.subf %36, %41 : vector<8x32xf32>
    %43 = arith.mulf %42, %42 : vector<8x32xf32>
    %cst_23 = arith.constant dense<0.000000e+00> : vector<8xf32>
    %44 = vector.multi_reduction <add>, %43, %cst_23 [1] : vector<8x32xf32> to vector<8xf32>
    %45 = vector.shape_cast %44 : vector<8xf32> to vector<8x1xf32>
    %cst_24 = arith.constant 3.200000e+01 : f32
    %46 = vector.broadcast %cst_24 : f32 to vector<8x1xf32>
    %47 = arith.divf %45, %46 : vector<8x1xf32>
    %48 = vector.broadcast %40 : vector<8x1xf32> to vector<8x32xf32>
    %49 = arith.subf %36, %48 : vector<8x32xf32>
    %cst_25 = arith.constant 9.99999974E-6 : f32
    %50 = vector.broadcast %cst_25 : f32 to vector<8x1xf32>
    %51 = arith.addf %47, %50 : vector<8x1xf32>
    %52 = math.rsqrt %51 : vector<8x1xf32>
    %53 = vector.broadcast %52 : vector<8x1xf32> to vector<8x32xf32>
    %54 = arith.mulf %49, %53 : vector<8x32xf32>
    %c1 = arith.constant 1 : index
    %c0_26 = arith.constant 0 : index
    %55 = vector.load %arg6[%c1, %c0_26] : memref<8x32xf32, #tpu.memory_space<vmem>>, vector<1x32xf32>
    %56 = vector.broadcast %55 : vector<1x32xf32> to vector<8x32xf32>
    %57 = arith.mulf %54, %56 : vector<8x32xf32>
    %c2 = arith.constant 2 : index
    %c0_27 = arith.constant 0 : index
    %58 = vector.load %arg6[%c2, %c0_27] : memref<8x32xf32, #tpu.memory_space<vmem>>, vector<1x32xf32>
    %59 = vector.broadcast %58 : vector<1x32xf32> to vector<8x32xf32>
    %60 = arith.addf %57, %59 : vector<8x32xf32>
    %cst_28 = arith.constant 0.000000e+00 : f32
    %61 = vector.broadcast %cst_28 : f32 to vector<8x32xf32>
    %62 = arith.maximumf %60, %61 : vector<8x32xf32>
    %63 = arith.truncf %62 : vector<8x32xf32> to vector<8x32xbf16>
    %c0_29 = arith.constant 0 : index
    %c0_30 = arith.constant 0 : index
    %64 = vector.load %arg7[%c0_29, %c0_30] : memref<32x1xbf16, #tpu.memory_space<vmem>>, vector<32x1xbf16>
    %cst_31 = arith.constant dense<0.000000e+00> : vector<8x1xf32>
    %65 = tpu.matmul %63, %64, %cst_31 {dimension_numbers = #tpu.dot_dimension_numbers<[1], [0], [0], [1], [0, 0, 1, 1], [], []>} : vector<8x32xbf16>, vector<32x1xbf16>, vector<8x1xf32> -> vector<8x1xf32>
    %c0_32 = arith.constant 0 : index
    %c0_33 = arith.constant 0 : index
    %66 = memref.load %arg8[%c0_32, %c0_33] : memref<1x1xf32, #tpu.memory_space<smem>>
    %67 = vector.broadcast %66 : f32 to vector<8x1xf32>
    %68 = arith.addf %65, %67 : vector<8x1xf32>
    %cst_34 = arith.constant 0.000000e+00 : f32
    %69 = vector.broadcast %cst_34 : f32 to vector<8x1xf32>
    %70 = arith.subf %69, %68 : vector<8x1xf32>
    %71 = math.exp %70 : vector<8x1xf32>
    %cst_35 = arith.constant 1.000000e+00 : f32
    %72 = vector.broadcast %cst_35 : f32 to vector<8x1xf32>
    %73 = arith.addf %72, %71 : vector<8x1xf32>
    %74 = tpu.reciprocal %73 {approx = true} : vector<8x1xf32> -> vector<8x1xf32>
    %75 = vector.broadcast %74 : vector<8x1xf32> to vector<8x128xf32>
    %76 = arith.mulf %26, %75 : vector<8x128xf32>
    %c0_36 = arith.constant 0 : index
    %c0_37 = arith.constant 0 : index
    %77 = vector.load %arg1[%c0_36, %c0_37] : memref<8x128xf32, #tpu.memory_space<vmem>>, vector<8x128xf32>
    %78 = arith.addf %77, %76 : vector<8x128xf32>
    %c0_38 = arith.constant 0 : index
    %c0_39 = arith.constant 0 : index
    %79 = vector.load %arg9[%c0_38, %c0_39] : memref<8x128xf32, #tpu.memory_space<vmem>>, vector<8x128xf32>
    tpu.vector_store %arg9[%c0_38, %c0_39], %78 {strides = array<i32>} : memref<8x128xf32, #tpu.memory_space<vmem>>, vector<8x128xf32>,
    return
  }
  func.func @transform_0(%arg0: i32) -> (i32, i32) {
    %c0_i32 = arith.constant 0 : i32
    %c0_i32_0 = arith.constant 0 : i32
    return %arg0, %c0_i32 : i32, i32
  }
  func.func @transform_1(%arg0: i32) -> (i32, i32) {
    %c0_i32 = arith.constant 0 : i32
    %c0_i32_0 = arith.constant 0 : i32
    return %arg0, %c0_i32 : i32, i32
  }
  func.func @transform_2(%arg0: i32) -> (i32, i32) {
    %c0_i32 = arith.constant 0 : i32
    %c0_i32_0 = arith.constant 0 : i32
    %c0_i32_1 = arith.constant 0 : i32
    return %c0_i32, %c0_i32_0 : i32, i32
  }
  func.func @transform_3(%arg0: i32) -> (i32, i32) {
    %c0_i32 = arith.constant 0 : i32
    %c0_i32_0 = arith.constant 0 : i32
    %c0_i32_1 = arith.constant 0 : i32
    return %c0_i32, %c0_i32_0 : i32, i32
  }
  func.func @transform_4(%arg0: i32) -> (i32, i32) {
    %c0_i32 = arith.constant 0 : i32
    %c0_i32_0 = arith.constant 0 : i32
    %c0_i32_1 = arith.constant 0 : i32
    return %c0_i32, %c0_i32_0 : i32, i32
  }
  func.func @transform_5(%arg0: i32) -> (i32, i32) {
    %c0_i32 = arith.constant 0 : i32
    %c0_i32_0 = arith.constant 0 : i32
    %c0_i32_1 = arith.constant 0 : i32
    return %c0_i32, %c0_i32_0 : i32, i32
  }
  func.func @transform_6(%arg0: i32) -> (i32, i32) {
    %c0_i32 = arith.constant 0 : i32
    %c0_i32_0 = arith.constant 0 : i32
    %c0_i32_1 = arith.constant 0 : i32
    return %c0_i32, %c0_i32_0 : i32, i32
  }
  func.func @transform_7(%arg0: i32) -> (i32, i32) {
    %c0_i32 = arith.constant 0 : i32
    %c0_i32_0 = arith.constant 0 : i32
    %c0_i32_1 = arith.constant 0 : i32
    return %c0_i32, %c0_i32_0 : i32, i32
  }
  func.func @transform_8(%arg0: i32) -> (i32, i32) {
    %c0_i32 = arith.constant 0 : i32
    %c0_i32_0 = arith.constant 0 : i32
    return %arg0, %c0_i32 : i32, i32
  }
}

module attributes {stable_mosaic.version = 11 : i64} {
  func.func @_decoder_kernel(%arg0: i32, %arg1: memref<8x128xf32, #tpu.memory_space<vmem>>, %arg2: memref<8x4xf32, #tpu.memory_space<vmem>>, %arg3: memref<68x128xbf16, #tpu.memory_space<vmem>>, %arg4: memref<16x32xbf16, #tpu.memory_space<vmem>>, %arg5: memref<4x32xbf16, #tpu.memory_space<vmem>>, %arg6: memref<8x32xf32, #tpu.memory_space<vmem>>, %arg7: memref<32x1xbf16, #tpu.memory_space<vmem>>, %arg8: memref<1x1xf32, #tpu.memory_space<smem>>, %arg9: memref<8x128xf32, #tpu.memory_space<vmem>>, %arg10: memref<8x68xbf16, #tpu.memory_space<vmem>>) attributes {dimension_semantics = [#tpu.dimension_semantics<parallel>], iteration_bounds = array<i64: 1>, scalar_prefetch = 0 : i64, scratch_operands = 1 : i64, tpu.core_type = #tpu.core_type<tc>, window_params = [{transform_indices = @transform_0, window_bounds = array<i64: 8, 128>}, {transform_indices = @transform_1, window_bounds = array<i64: 8, 4>}, {pipeline_mode = #tpu.pipeline_mode<synchronous>, transform_indices = @transform_2, window_bounds = array<i64: 68, 128>}, {pipeline_mode = #tpu.pipeline_mode<synchronous>, transform_indices = @transform_3, window_bounds = array<i64: 16, 32>}, {pipeline_mode = #tpu.pipeline_mode<synchronous>, transform_indices = @transform_4, window_bounds = array<i64: 4, 32>}, {pipeline_mode = #tpu.pipeline_mode<synchronous>, transform_indices = @transform_5, window_bounds = array<i64: 8, 32>}, {pipeline_mode = #tpu.pipeline_mode<synchronous>, transform_indices = @transform_6, window_bounds = array<i64: 32, 1>}, {transform_indices = @transform_7, window_bounds = array<i64: 1, 1>}, {transform_indices = @transform_8, window_bounds = array<i64: 8, 128>}]} {
    %c0 = arith.constant 0 : index
    %c0_0 = arith.constant 0 : index
    %0 = vector.load %arg2[%c0, %c0_0] : memref<8x4xf32, #tpu.memory_space<vmem>>, vector<8x4xf32>
    %c0_1 = arith.constant 0 : index
    %c0_2 = arith.constant 0 : index
    %1 = vector.load %arg1[%c0_1, %c0_2] : memref<8x128xf32, #tpu.memory_space<vmem>>, vector<8x16xf32>
    %2 = vector.extract_strided_slice %0 {offsets = [0, 0], sizes = [8, 1], strides = [1, 1]} : vector<8x4xf32> to vector<8x1xf32>
    %3 = vector.broadcast %2 : vector<8x1xf32> to vector<8x16xf32>
    %4 = arith.mulf %3, %1 : vector<8x16xf32>
    %5 = arith.truncf %4 : vector<8x16xf32> to vector<8x16xbf16>
    %c0_3 = arith.constant 0 : index
    %c0_4 = arith.constant 0 : index
    %6 = vector.load %arg10[%c0_3, %c0_4] : memref<8x68xbf16, #tpu.memory_space<vmem>>, vector<8x16xbf16>
    tpu.vector_store %arg10[%c0_3, %c0_4], %5 {strides = array<i32>} : memref<8x68xbf16, #tpu.memory_space<vmem>>, vector<8x16xbf16>,
    %7 = vector.extract_strided_slice %0 {offsets = [0, 1], sizes = [8, 1], strides = [1, 1]} : vector<8x4xf32> to vector<8x1xf32>
    %8 = vector.broadcast %7 : vector<8x1xf32> to vector<8x16xf32>
    %9 = arith.mulf %8, %1 : vector<8x16xf32>
    %10 = arith.truncf %9 : vector<8x16xf32> to vector<8x16xbf16>
    %c0_5 = arith.constant 0 : index
    %c16 = arith.constant 16 : index
    %11 = vector.load %arg10[%c0_5, %c16] : memref<8x68xbf16, #tpu.memory_space<vmem>>, vector<8x16xbf16>
    tpu.vector_store %arg10[%c0_5, %c16], %10 {strides = array<i32>} : memref<8x68xbf16, #tpu.memory_space<vmem>>, vector<8x16xbf16>,
    %12 = vector.extract_strided_slice %0 {offsets = [0, 2], sizes = [8, 1], strides = [1, 1]} : vector<8x4xf32> to vector<8x1xf32>
    %13 = vector.broadcast %12 : vector<8x1xf32> to vector<8x16xf32>
    %14 = arith.mulf %13, %1 : vector<8x16xf32>
    %15 = arith.truncf %14 : vector<8x16xf32> to vector<8x16xbf16>
    %c0_6 = arith.constant 0 : index
    %c32 = arith.constant 32 : index
    %16 = vector.load %arg10[%c0_6, %c32] : memref<8x68xbf16, #tpu.memory_space<vmem>>, vector<8x16xbf16>
    tpu.vector_store %arg10[%c0_6, %c32], %15 {strides = array<i32>} : memref<8x68xbf16, #tpu.memory_space<vmem>>, vector<8x16xbf16>,
    %17 = vector.extract_strided_slice %0 {offsets = [0, 3], sizes = [8, 1], strides = [1, 1]} : vector<8x4xf32> to vector<8x1xf32>
    %18 = vector.broadcast %17 : vector<8x1xf32> to vector<8x16xf32>
    %19 = arith.mulf %18, %1 : vector<8x16xf32>
    %20 = arith.truncf %19 : vector<8x16xf32> to vector<8x16xbf16>
    %c0_7 = arith.constant 0 : index
    %c48 = arith.constant 48 : index
    %21 = vector.load %arg10[%c0_7, %c48] : memref<8x68xbf16, #tpu.memory_space<vmem>>, vector<8x16xbf16>
    tpu.vector_store %arg10[%c0_7, %c48], %20 {strides = array<i32>} : memref<8x68xbf16, #tpu.memory_space<vmem>>, vector<8x16xbf16>,
    %22 = arith.truncf %0 : vector<8x4xf32> to vector<8x4xbf16>
    %c0_8 = arith.constant 0 : index
    %c64 = arith.constant 64 : index
    %23 = vector.load %arg10[%c0_8, %c64] : memref<8x68xbf16, #tpu.memory_space<vmem>>, vector<8x4xbf16>
    tpu.vector_store %arg10[%c0_8, %c64], %22 {strides = array<i32>} : memref<8x68xbf16, #tpu.memory_space<vmem>>, vector<8x4xbf16>,
    %c0_9 = arith.constant 0 : index
    %c0_10 = arith.constant 0 : index
    %24 = vector.load %arg10[%c0_9, %c0_10] : memref<8x68xbf16, #tpu.memory_space<vmem>>, vector<8x68xbf16>
    %c0_11 = arith.constant 0 : index
    %c0_12 = arith.constant 0 : index
    %25 = vector.load %arg3[%c0_11, %c0_12] : memref<68x128xbf16, #tpu.memory_space<vmem>>, vector<68x128xbf16>
    %cst = arith.constant dense<0.000000e+00> : vector<8x128xf32>
    %26 = tpu.matmul %24, %25, %cst {dimension_numbers = #tpu.dot_dimension_numbers<[1], [0], [0], [1], [0, 0, 1, 1], [], []>} : vector<8x68xbf16>, vector<68x128xbf16>, vector<8x128xf32> -> vector<8x128xf32>
    %27 = arith.truncf %1 : vector<8x16xf32> to vector<8x16xbf16>
    %c0_13 = arith.constant 0 : index
    %c0_14 = arith.constant 0 : index
    %28 = vector.load %arg4[%c0_13, %c0_14] : memref<16x32xbf16, #tpu.memory_space<vmem>>, vector<16x32xbf16>
    %cst_15 = arith.constant dense<0.000000e+00> : vector<8x32xf32>
    %29 = tpu.matmul %27, %28, %cst_15 {dimension_numbers = #tpu.dot_dimension_numbers<[1], [0], [0], [1], [0, 0, 1, 1], [], []>} : vector<8x16xbf16>, vector<16x32xbf16>, vector<8x32xf32> -> vector<8x32xf32>
    %30 = arith.truncf %0 : vector<8x4xf32> to vector<8x4xbf16>
    %c0_16 = arith.constant 0 : index
    %c0_17 = arith.constant 0 : index
    %31 = vector.load %arg5[%c0_16, %c0_17] : memref<4x32xbf16, #tpu.memory_space<vmem>>, vector<4x32xbf16>
    %cst_18 = arith.constant dense<0.000000e+00> : vector<8x32xf32>
    %32 = tpu.matmul %30, %31, %cst_18 {dimension_numbers = #tpu.dot_dimension_numbers<[1], [0], [0], [1], [0, 0, 1, 1], [], []>} : vector<8x4xbf16>, vector<4x32xbf16>, vector<8x32xf32> -> vector<8x32xf32>
    %33 = arith.addf %29, %32 : vector<8x32xf32>
    %c0_19 = arith.constant 0 : index
    %c0_20 = arith.constant 0 : index
    %34 = vector.load %arg6[%c0_19, %c0_20] : memref<8x32xf32, #tpu.memory_space<vmem>>, vector<1x32xf32>
    %35 = vector.broadcast %34 : vector<1x32xf32> to vector<8x32xf32>
    %36 = arith.addf %33, %35 : vector<8x32xf32>
    %cst_21 = arith.constant dense<0.000000e+00> : vector<8xf32>
    %37 = vector.multi_reduction <add>, %36, %cst_21 [1] : vector<8x32xf32> to vector<8xf32>
    %38 = vector.shape_cast %37 : vector<8xf32> to vector<8x1xf32>
    %cst_22 = arith.constant 3.200000e+01 : f32
    %39 = vector.broadcast %cst_22 : f32 to vector<8x1xf32>
    %40 = arith.divf %38, %39 : vector<8x1xf32>
    %41 = vector.broadcast %40 : vector<8x1xf32> to vector<8x32xf32>
    %42 = arith.subf %36, %41 : vector<8x32xf32>
    %43 = arith.mulf %42, %42 : vector<8x32xf32>
    %cst_23 = arith.constant dense<0.000000e+00> : vector<8xf32>
    %44 = vector.multi_reduction <add>, %43, %cst_23 [1] : vector<8x32xf32> to vector<8xf32>
    %45 = vector.shape_cast %44 : vector<8xf32> to vector<8x1xf32>
    %cst_24 = arith.constant 3.200000e+01 : f32
    %46 = vector.broadcast %cst_24 : f32 to vector<8x1xf32>
    %47 = arith.divf %45, %46 : vector<8x1xf32>
    %48 = vector.broadcast %40 : vector<8x1xf32> to vector<8x32xf32>
    %49 = arith.subf %36, %48 : vector<8x32xf32>
    %cst_25 = arith.constant 9.99999974E-6 : f32
    %50 = vector.broadcast %cst_25 : f32 to vector<8x1xf32>
    %51 = arith.addf %47, %50 : vector<8x1xf32>
    %52 = math.rsqrt %51 : vector<8x1xf32>
    %53 = vector.broadcast %52 : vector<8x1xf32> to vector<8x32xf32>
    %54 = arith.mulf %49, %53 : vector<8x32xf32>
    %c1 = arith.constant 1 : index
    %c0_26 = arith.constant 0 : index
    %55 = vector.load %arg6[%c1, %c0_26] : memref<8x32xf32, #tpu.memory_space<vmem>>, vector<1x32xf32>
    %56 = vector.broadcast %55 : vector<1x32xf32> to vector<8x32xf32>
    %57 = arith.mulf %54, %56 : vector<8x32xf32>
    %c2 = arith.constant 2 : index
    %c0_27 = arith.constant 0 : index
    %58 = vector.load %arg6[%c2, %c0_27] : memref<8x32xf32, #tpu.memory_space<vmem>>, vector<1x32xf32>
    %59 = vector.broadcast %58 : vector<1x32xf32> to vector<8x32xf32>
    %60 = arith.addf %57, %59 : vector<8x32xf32>
    %cst_28 = arith.constant 0.000000e+00 : f32
    %61 = vector.broadcast %cst_28 : f32 to vector<8x32xf32>
    %62 = arith.maximumf %60, %61 : vector<8x32xf32>
    %63 = arith.truncf %62 : vector<8x32xf32> to vector<8x32xbf16>
    %c0_29 = arith.constant 0 : index
    %c0_30 = arith.constant 0 : index
    %64 = vector.load %arg7[%c0_29, %c0_30] : memref<32x1xbf16, #tpu.memory_space<vmem>>, vector<32x1xbf16>
    %cst_31 = arith.constant dense<0.000000e+00> : vector<8x1xf32>
    %65 = tpu.matmul %63, %64, %cst_31 {dimension_numbers = #tpu.dot_dimension_numbers<[1], [0], [0], [1], [0, 0, 1, 1], [], []>} : vector<8x32xbf16>, vector<32x1xbf16>, vector<8x1xf32> -> vector<8x1xf32>
    %c0_32 = arith.constant 0 : index
    %c0_33 = arith.constant 0 : index
    %66 = memref.load %arg8[%c0_32, %c0_33] : memref<1x1xf32, #tpu.memory_space<smem>>
    %67 = vector.broadcast %66 : f32 to vector<8x1xf32>
    %68 = arith.addf %65, %67 : vector<8x1xf32>
    %cst_34 = arith.constant 0.000000e+00 : f32
    %69 = vector.broadcast %cst_34 : f32 to vector<8x1xf32>
    %70 = arith.subf %69, %68 : vector<8x1xf32>
    %71 = math.exp %70 : vector<8x1xf32>
    %cst_35 = arith.constant 1.000000e+00 : f32
    %72 = vector.broadcast %cst_35 : f32 to vector<8x1xf32>
    %73 = arith.addf %72, %71 : vector<8x1xf32>
    %74 = tpu.reciprocal %73 {approx = true} : vector<8x1xf32> -> vector<8x1xf32>
    %75 = vector.broadcast %74 : vector<8x1xf32> to vector<8x128xf32>
    %76 = arith.mulf %26, %75 : vector<8x128xf32>
    %c0_36 = arith.constant 0 : index
    %c0_37 = arith.constant 0 : index
    %77 = vector.load %arg1[%c0_36, %c0_37] : memref<8x128xf32, #tpu.memory_space<vmem>>, vector<8x128xf32>
    %78 = arith.addf %77, %76 : vector<8x128xf32>
    %c0_38 = arith.constant 0 : index
    %c0_39 = arith.constant 0 : index
    %79 = vector.load %arg9[%c0_38, %c0_39] : memref<8x128xf32, #tpu.memory_space<vmem>>, vector<8x128xf32>
    tpu.vector_store %arg9[%c0_38, %c0_39], %78 {strides = array<i32>} : memref<8x128xf32, #tpu.memory_space<vmem>>, vector<8x128xf32>,
    return
  }
  func.func @transform_0(%arg0: i32) -> (i32, i32) {
    %c0_i32 = arith.constant 0 : i32
    %c0_i32_0 = arith.constant 0 : i32
    return %arg0, %c0_i32 : i32, i32
  }
  func.func @transform_1(%arg0: i32) -> (i32, i32) {
    %c0_i32 = arith.constant 0 : i32
    %c0_i32_0 = arith.constant 0 : i32
    return %arg0, %c0_i32 : i32, i32
  }
  func.func @transform_2(%arg0: i32) -> (i32, i32) {
    %c0_i32 = arith.constant 0 : i32
    %c0_i32_0 = arith.constant 0 : i32
    %c0_i32_1 = arith.constant 0 : i32
    return %c0_i32, %c0_i32_0 : i32, i32
  }
  func.func @transform_3(%arg0: i32) -> (i32, i32) {
    %c0_i32 = arith.constant 0 : i32
    %c0_i32_0 = arith.constant 0 : i32
    %c0_i32_1 = arith.constant 0 : i32
    return %c0_i32, %c0_i32_0 : i32, i32
  }
  func.func @transform_4(%arg0: i32) -> (i32, i32) {
    %c0_i32 = arith.constant 0 : i32
    %c0_i32_0 = arith.constant 0 : i32
    %c0_i32_1 = arith.constant 0 : i32
    return %c0_i32, %c0_i32_0 : i32, i32
  }
  func.func @transform_5(%arg0: i32) -> (i32, i32) {
    %c0_i32 = arith.constant 0 : i32
    %c0_i32_0 = arith.constant 0 : i32
    %c0_i32_1 = arith.constant 0 : i32
    return %c0_i32, %c0_i32_0 : i32, i32
  }
  func.func @transform_6(%arg0: i32) -> (i32, i32) {
    %c0_i32 = arith.constant 0 : i32
    %c0_i32_0 = arith.constant 0 : i32
    %c0_i32_1 = arith.constant 0 : i32
    return %c0_i32, %c0_i32_0 : i32, i32
  }
  func.func @transform_7(%arg0: i32) -> (i32, i32) {
    %c0_i32 = arith.constant 0 : i32
    %c0_i32_0 = arith.constant 0 : i32
    %c0_i32_1 = arith.constant 0 : i32
    return %c0_i32, %c0_i32_0 : i32, i32
  }
  func.func @transform_8(%arg0: i32) -> (i32, i32) {
    %c0_i32 = arith.constant 0 : i32
    %c0_i32_0 = arith.constant 0 : i32
    return %arg0, %c0_i32 : i32, i32
  }
}

</mosaic_0001>

<bundles_post_ra>
// kernel: tpu_custom_call.1
= control target key start
LH: loop header
LB: loop body
LE: loop exit
PB: predicated region body
PF: predicated region fallthrough
CT: control target
= control target key end

     0   :  { %14 = vsyncpa [#allocation5], 0  ;;  %s766_s0 = inlined_call_operand.hbm [shape: f32[8,128], index: 0, kind: input, shape index: {}]   ;;  %s767_s1 = inlined_call_operand.vmem [shape: f32[8,4], index: 1, kind: input, shape index: {}]   ;;  %s768_s2 = inlined_call_operand.vmem [shape: bf16[68,128], index: 2, kind: input, shape index: {}]   ;;  %s769_s3 = inlined_call_operand.vmem [shape: bf16[16,32], index: 3, kind: input, shape index: {}]   ;;  %s770_s4 = inlined_call_operand.vmem [shape: bf16[4,32], index: 4, kind: input, shape index: {}]   ;;  %s771_s5 = inlined_call_operand.hbm [shape: f32[8,32], index: 5, kind: input, shape index: {}]   ;;  %s772_s6 = inlined_call_operand.vmem [shape: bf16[32,1], index: 6, kind: input, shape index: {}]   ;;  %s773_s7 = inlined_call_operand.<no memory space> [shape: f32[1,1], index: 7, kind: input, shape index: {}]   ;;  %s774_s8 = inlined_call_operand.hbm [shape: f32[8,128], index: 8, kind: output, shape index: {}]  }
   0x1   :  { %15 = vsyncpa [#allocation8], 0 }
   0x2   :  { %16 = vsyncpa [#allocation6], 0  ;;  %s604_s27 = smov [#allocation4]   ;;  %s605_s29 = smov [#allocation7]  }
   0x3   :  { %s23_s28 = sshll.u32 %s604_s27, 4  ;;  %s41_s30 = sshll.u32 %s605_s29, 4  ;;  %s24_s28 = int_to_ptr.vmem [resolvable:$true] %s23_s28  ;;  %s42_s30 = int_to_ptr.vmem [resolvable:$true] %s41_s30 }
   0x4   :  { %s532_s11 = scalar_lea.hbm %s766_s0, 128 }
   0x5   :  { %p533_p0 = scmp.ne.s32.totalorder %s766_s0, %s532_s11  ;;  %p536_p1 = scmp.lt.u32.totalorder %s532_s11, %s766_s0 }
   0x7   :  { %p538_p2 = pnand %p536_p1, %p533_p0 }
   0x9   :  { %541 = shalt.err (!%p538_p2)
}
   0xa   :  { %s542_s16 = scalar_lea.vmem %s24_s28, 128  ;;  %p547_p4 = scmp.lt.s32.totalorder %s24_s28, %s24_s28 }
   0xb   :  { %p543_p3 = scmp.ne.s32.totalorder %s24_s28, %s542_s16  ;;  %p548_p5 = scmp.lt.s32.totalorder %s542_s16, %s542_s16 }
   0xd   :  { %p549_p6 = por %p548_p5, %p547_p4 }
   0xf   :  { %p550_p7 = pnand %p549_p6, %p543_p3 }
  0x11   :  { %553 = shalt.err (!%p550_p7)
}
  0x12   :  { %26 = dma.hbm_to_vmem [thread:$0]  %s766_s0, 128, %s24_s28, [#allocation5]  }
  0x13   :  { %s554_s21 = scalar_lea.hbm %s771_s5, 128 }
  0x14   :  { %p555_p8 = scmp.ne.s32.totalorder %s771_s5, %s554_s21  ;;  %p558_p9 = scmp.lt.u32.totalorder %s554_s21, %s771_s5 }
  0x16   :  { %p560_p10 = pnand %p558_p9, %p555_p8 }
  0x18   :  { %563 = shalt.err (!%p560_p10)
}
  0x19   :  { %s564_s26 = scalar_lea.vmem %s42_s30, 128  ;;  %p569_p12 = scmp.lt.s32.totalorder %s42_s30, %s42_s30 }
  0x1a   :  { %p565_p11 = scmp.ne.s32.totalorder %s42_s30, %s564_s26  ;;  %p570_p13 = scmp.lt.s32.totalorder %s564_s26, %s564_s26 }
  0x1c   :  { %p571_p0 = por %p570_p13, %p569_p12 }
  0x1e   :  { %p572_p1 = pnand %p571_p0, %p565_p11 }
  0x20   :  { %575 = shalt.err (!%p572_p1)
}
  0x21   :  { %44 = dma.hbm_to_vmem [thread:$0]  %s771_s5, 128, %s42_s30, [#allocation8]  }
  0x22   :  { %598 = dma.done.wait [#allocation5], 128  }
  0x23   :  { %599 = vsyncadd [#allocation5], 4294967168 }
  0x24   :  { %600 = dma.done.wait [#allocation8], 128  }
  0x25   :  { %601 = vsyncadd [#allocation8], 4294967168  ;;  %v606_v0 = vmov 0.0   ;;  %vm607_vm0 = vmmov 0   ;;  %vm159_vm1 = vcmask 1041408   ;;  %v56_v2 = vld [vmem:[%s767_s1] sm:$0xff] }
  0x26   :  { %480 = vmatprep.subr.bf16.mxu1 %v606_v0  ;;  %482 = vmatprep.mubr.msk.bf16.mxu1 %vm607_vm0, %v606_v0  ;;  %v206_v1 = vld [vmem:[%s770_s4] sm:$0x3]  ;;  %v699_v4 = vpack.c.bf16 %v56_v2, %v56_v2  ;;  %vm207_vm2 = vcmask 31744   ;;  %v708_v6 = vld [vmem:[#allocation4] sm:$0xff]  ;;  %vm260_vm3 = vcmask 130048   ;;  %vm310_vm4 = vcmask 261120  }
  0x27   :  { %466 = vmatprep.subr.bf16.mxu0 %v606_v0  ;;  %476 = vmatprep.mubr.msk.bf16.mxu0 %vm607_vm0, %v606_v0  ;;  %v212_v3 = vsel %vm159_vm1, %v206_v1, 0  ;;  %v518_v5 = vld [vmem:[%s769_s3] sm:$0xff]   ;;  %v203_v7 = vpack.c.bf16 %v708_v6, %v708_v6  ;;  %v443_v13 = vld [vmem:[#allocation7] ss:$0 sm:$0xff]  ;;  %v608_v20 = vmov 1   ;;  %v609_v21 = vmov 3  }
  0x28   :  { %481 = vmatpush3.bf16.msra.mxu1 %v212_v3  ;;  %513 = vset.pattern.permute.xlu1 %v608_v20  ;;  %v610_v22 = vmov 2   ;;  %v519_v28 = vld [vmem:[%s772_s6] sm:$0xff]   ;;  %v520_v29 = vld [vmem:[%s772_s6 + $0x8] sm:$0xff]   ;;  %v611_v31 = vmov 0   ;;  %s612_s12 = smov 16   ;;  %s613_s6 = smov 32   ;;  %v344_v1 = vstv %s773_s7 }
  0x29   :  { %486 = vmatprep.subr.bf16.mxu1 %v606_v0  ;;  %515 = vset.pattern.permute.xlu0 %v609_v21  ;;  %v521_v37 = vld [vmem:[%s768_s2] sm:$0xff]   ;;  %v522_v38 = vld [vmem:[%s768_s2 + $0x8] sm:$0xff]   ;;  %v523_v40 = vld [vmem:[%s768_s2 + $0x10] sm:$0xff]   ;;  %s614_s23 = smov 48   ;;  %s615_s24 = smov 64   ;;  %vm65_vm5 = vcmask 125952  }
  0x2a   :  { %68 = vperm.xlu1 %513, %v56_v2   ;;  %467 = vmatpush3.bf16.msra.mxu0 %v521_v37  ;;  %v524_v43 = vld [vmem:[%s768_s2 + $0x18] sm:$0xff]   ;;  %v525_v44 = vld [vmem:[%s768_s2 + $0x20] ss:$0 sps:$4 sm:$0x33]   ;;  %v444_v50 = vld [vmem:[#allocation7 + $0x1] ss:$0 sm:$0xff] }
  0x2b   :  { %483 = vmatmul.mubr.msk.bf16.vlgmr.msra.gmra.mrb[0].mxu1 %vm207_vm2, %v699_v4  ;;  %468 = vmatprep.subr.bf16.mxu0 %v606_v0  ;;  %v161_v45 = vsel %vm159_vm1, %v525_v44, 0  ;;  %v445_v52 = vld [vmem:[#allocation7 + $0x2] ss:$0 sm:$0xff]  ;;  %vm79_vm6 = vcmask 257152   ;;  %vm93_vm7 = vcmask 388352   ;;  %vm107_vm8 = vcmask 519552  }
  0x2c   :  { %487 = vmatpush3.bf16.msra.mxu1 %v518_v5  ;;  %488 = vmatprep.mubr.msk.bf16.mxu1 %vm607_vm0, %v606_v0  ;;  %vm116_vm9 = vcmask 552448   ;;  %vm155_vm10 = vcmask 556032   ;;  %s616_s26 = smov [#allocation9]  }
  0x2d   :  { %492 = vmatprep.subr.bf16.mxu1 %v606_v0  ;;  %s420_s7 = sshll.u32 %s616_s26, 4  ;;  %s421_s7 = int_to_ptr.vmem [resolvable:$true] %s420_s7 }
  0x2e   :  { %514 = vset.pattern.permute.xlu1 %v610_v22  ;;  %469 = vmatpush3.bf16.msra.mxu0 %v522_v38  ;;  %s576_s0 = scalar_lea.vmem %s421_s7, 128  ;;  %p581_p3 = scmp.lt.s32.totalorder %s421_s7, %s421_s7 }
  0x2f   :  { %82 = vperm.xlu1 %514, %v56_v2   ;;  %470 = vmatprep.subr.bf16.mxu0 %v606_v0  ;;  %p577_p2 = scmp.ne.s32.totalorder %s421_s7, %s576_s0  ;;  %p582_p4 = scmp.lt.s32.totalorder %s576_s0, %s576_s0 }
  0x31   :  { %p583_p5 = por %p582_p4, %p581_p3 }
  0x32   :  { %471 = vmatpush3.bf16.msra.mxu0 %v523_v40 }
  0x33   :  { %489 = vmatmul.mubr.msk.bf16.vlgmr.msra.gmra.mrb[4].mxu1 %vm260_vm3, %v203_v7  ;;  %516 = vset.pattern.permute.xlu1 %v611_v31  ;;  %p584_p6 = pnand %p583_p5, %p577_p2 }
  0x34   :  { %496 = vmatprep.mubr.msk.bf16.mxu1 %vm607_vm0, %v606_v0  ;;  %493 = vmatpush3.bf16.msra.mxu1 %v519_v28 }
  0x35   :  { %494 = vmatprep.subr.bf16.mxu1 %v606_v0  ;;  %60 = vperm.xlu1 %516, %v56_v2  }
  0x36   :  { %472 = vmatprep.subr.bf16.mxu0 %v606_v0 }
  0x37   :  { %473 = vmatpush3.bf16.msra.mxu0 %v524_v43 }
  0x38   :  { %495 = vmatpush3.bf16.msra.mxu1 %v520_v29  ;;  %474 = vmatprep.subr.bf16.mxu0 %v606_v0 }
  0x3b   :  { %475 = vmatpush3.bf16.msra.mxu0 %v161_v45 }
  0xa9   :  { %v69_v30 = vpop.permute.xlu1 %68 }
  0xaa   :  { %v71_v32 = vmul.f32 %v69_v30, %v708_v6 }
  0xac   :  { %v449_v33 = vpack.c.bf16 %v71_v32, %v71_v32 }
  0xae   :  { %v83_v34 = vpop.permute.xlu1 %82  ;;  %76 = vrot.lane.b32.xlu1 %v449_v33, %s612_s12 }
  0xaf   :  { %v85_v35 = vmul.f32 %v83_v34, %v708_v6 }
  0xb1   :  { %v450_v36 = vpack.c.bf16 %v85_v35, %v85_v35 }
  0xb3   :  { %90 = vrot.lane.b32.xlu1 %v450_v36, %s613_s6 }
  0xb4   :  { %v61_v57 = vpop.permute.xlu1 %60 }
  0xb5   :  { %v63_v58 = vmul.f32 %v61_v57, %v708_v6 }
  0xb7   :  { %v64_v59 = vpack.c.bf16 %v63_v58, %v63_v58 }
  0xb9   :  { %66 = vst.msk [vmem:[#allocation2] sm:$0xf] %vm65_vm5, %v64_v59 }
  0xfe   :  { %v248_v8 = vpop.f32.mrb[0].mxu1 }
  0xff   :  { %v484_v9 = vpop.f32.mrb[1].mxu1 }
 0x100   :  { %v251_v10 = vpop.f32.mrb[2].mxu1 }
 0x101   :  { %v485_v11 = vpop.f32.mrb[3].mxu1 }
 0x106   :  { %v298_v12 = vpop.f32.mrb[4].mxu1 }
 0x107   :  { %v299_v14 = vadd.f32 %v298_v12, %v248_v8  ;;  %v490_v15 = vpop.f32.mrb[5].mxu1 }
 0x108   :  { %v301_v16 = vpop.f32.mrb[6].mxu1 }
 0x109   :  { %v491_v17 = vpop.f32.mrb[7].mxu1  ;;  %v309_v18 = vadd.f32 %v443_v13, %v299_v14 }
 0x10b   :  { %v311_v19 = vsel %vm310_vm4, %v309_v18, 0.0 }
 0x10c   :  { %312 = vadd.xlane.f32.xlu0 %v311_v19 }
 0x120   :  { %v77_v60 = vpop.permute.xlu1 %76 }
 0x121   :  { %80 = vst.msk [vmem:[#allocation2] sm:$0xf] %vm79_vm6, %v77_v60 }
 0x125   :  { %v91_v61 = vpop.permute.xlu1 %90 }
 0x126   :  { %94 = vst.msk [vmem:[#allocation2] sm:$0xf] %vm93_vm7, %v91_v61 }
 0x199   :  { %v313_v23 = vpop.xlane.xlu0 %312 }
 0x19a   :  { %v315_v24 = vmul.f32 0.03125, %v313_v23 }
 0x19c   :  { %v316_v25 = vsub.f32 %v309_v18, %v315_v24 }
 0x19e   :  { %v317_v26 = vmul.f32 %v316_v25, %v316_v25 }
 0x1a0   :  { %v318_v27 = vsel %vm310_vm4, %v317_v26, 0.0 }
 0x1a1   :  { %319 = vadd.xlane.f32.xlu0 %v318_v27 }
 0x1b7   :  { %96 = vperm.xlu0 %515, %v56_v2  }
 0x1bb   :  { %517 = vset.pattern.permute.xlu0 %v611_v31 }
 0x22e   :  { %v320_v39 = vpop.xlane.xlu0 %319 }
 0x22f   :  { %v321_v41 = vmul.f32 0.03125, %v320_v39 }
 0x231   :  { %v322_v42 = vadd.f32 1e-05, %v321_v41 }
 0x233   :  { %526 = vrsqrt.f32 %v322_v42 }
 0x236   :  { %v97_v46 = vpop.permute.xlu0 %96 }
 0x237   :  { %v99_v47 = vmul.f32 %v97_v46, %v708_v6 }
 0x239   :  { %v451_v48 = vpack.c.bf16 %v99_v47, %v99_v47 }
 0x23b   :  { %104 = vrot.lane.b32.xlu1 %v451_v48, %s614_s23 }
 0x23d   :  { %v527_v49 = vpop.eup %526 }
 0x23e   :  { %v324_v51 = vmul.f32 %v527_v49, %v316_v25 }
 0x23f   :  { %113 = vrot.lane.b32.xlu1 %v699_v4, %s615_s24 }
 0x240   :  { %v330_v53 = vmul.f32 %v444_v50, %v324_v51 }
 0x242   :  { %v336_v54 = vadd.f32 %v445_v52, %v330_v53 }
 0x244   :  { %v337_v55 = vmax.f32 %v336_v54, 0.0 }
 0x246   :  { %v338_v56 = vpack.c.bf16 %v337_v55, %v337_v55 }
 0x248   :  { %497 = vmatmul.mubr.msk.bf16.vlgmr.msra.gmra.mrb[8].mxu1 %vm310_vm4, %v338_v56 }
 0x2ad   :  { %v105_v62 = vpop.permute.xlu1 %104 }
 0x2ae   :  { %108 = vst.msk [vmem:[#allocation2] sm:$0xf] %vm107_vm8, %v105_v62 }
 0x2b1   :  { %v114_v63 = vpop.permute.xlu1 %113 }
 0x2b2   :  { %117 = vst.msk [vmem:[#allocation2] sm:$0xf] %vm116_vm9, %v114_v63 }
 0x2b9   :  { %v118_v0 = vld [vmem:[#allocation2] sm:$0xf] }
 0x2ba   :  { %477 = vmatmul.mubr.msk.bf16.vlgmr.msra.gmra.mrb[0].mxu0 %vm155_vm10, %v118_v0 }
 0x31b   :  { %v394_v2 = vpop.f32.mrb[8].mxu1 }
 0x31c   :  { %v395_v3 = vadd.f32 %v394_v2, %v344_v1  ;;  %v498_v4 = vpop.f32.mrb[9].mxu1 }
 0x31d   :  { %v397_v5 = vpop.f32.mrb[10].mxu1 }
 0x31e   :  { %v400_v7 = vsub.f32 0.0, %v395_v3  ;;  %v499_v8 = vpop.f32.mrb[11].mxu1 }
 0x320   :  { %v401_v9 = vmul.f32 1.442695, %v400_v7 }
 0x322   :  { %528 = vpow2.f32 %v401_v9 }
 0x32c   :  { %v529_v10 = vpop.eup %528 }
 0x32d   :  { %v403_v11 = vadd.f32 1.0, %v529_v10 }
 0x32f   :  { %530 = vrcp.f32 %v403_v11 }
 0x339   :  { %v531_v12 = vpop.eup %530 }
 0x33a   :  { %407 = vperm.xlu1 %516, %v531_v12  }
 0x38d   :  { %v197_v13 = vpop.f32.mrb[0].mxu0 }
 0x38e   :  { %v478_v14 = vpop.f32.mrb[1].mxu0 }
 0x38f   :  { %v200_v15 = vpop.f32.mrb[2].mxu0 }
 0x390   :  { %v479_v16 = vpop.f32.mrb[3].mxu0 }
 0x3b9   :  { %v408_v17 = vpop.permute.xlu1 %407 }
 0x3ba   :  { %v410_v18 = vmul.f32 %v408_v17, %v197_v13 }
 0x3bc   :  { %v412_v19 = vadd.f32 %v410_v18, %v708_v6 }
 0x3be   :  { %413 = vst [vmem:[#allocation9] sm:$0xff] %v412_v19 }
 0x3bf   :  { %587 = shalt.err (!%p584_p6)
}
 0x3c0   :  { %s588_s29 = scalar_lea.hbm %s774_s8, 128 }
 0x3c1   :  { %p589_p7 = scmp.ne.s32.totalorder %s774_s8, %s588_s29  ;;  %p592_p8 = scmp.lt.u32.totalorder %s588_s29, %s774_s8 }
 0x3c3   :  { %p594_p9 = pnand %p592_p8, %p589_p7 }
 0x3c5   :  { %597 = shalt.err (!%p594_p9)
}
 0x3c6   :  { %423 = dma.vmem_to_hbm [thread:$0]  %s421_s7, 128, %s774_s8, [#allocation6]  }
 0x3c7   :  { %602 = dma.done.wait [#allocation6], 128  }
 0x3c8   :  { %603 = vsyncadd [#allocation6], 4294967168 }
 0x3c9   :  { %427 = vsyncpa [#allocation5], 1 }
 0x3ca   :  { %428 = vsyncpa [#allocation8], 1 }
 0x3cb   :  { %429 = vsyncpa [#allocation6], 1 }

// kernel: tpu_custom_call.1
= control target key start
LH: loop header
LB: loop body
LE: loop exit
PB: predicated region body
PF: predicated region fallthrough
CT: control target
= control target key end

     0   :  { %14 = vsyncpa [#allocation5], 0  ;;  %s766_s0 = inlined_call_operand.hbm [shape: f32[8,128], index: 0, kind: input, shape index: {}]   ;;  %s767_s1 = inlined_call_operand.vmem [shape: f32[8,4], index: 1, kind: input, shape index: {}]   ;;  %s768_s2 = inlined_call_operand.vmem [shape: bf16[68,128], index: 2, kind: input, shape index: {}]   ;;  %s769_s3 = inlined_call_operand.vmem [shape: bf16[16,32], index: 3, kind: input, shape index: {}]   ;;  %s770_s4 = inlined_call_operand.vmem [shape: bf16[4,32], index: 4, kind: input, shape index: {}]   ;;  %s771_s5 = inlined_call_operand.hbm [shape: f32[8,32], index: 5, kind: input, shape index: {}]   ;;  %s772_s6 = inlined_call_operand.vmem [shape: bf16[32,1], index: 6, kind: input, shape index: {}]   ;;  %s773_s7 = inlined_call_operand.<no memory space> [shape: f32[1,1], index: 7, kind: input, shape index: {}]   ;;  %s774_s8 = inlined_call_operand.hbm [shape: f32[8,128], index: 8, kind: output, shape index: {}]  }
   0x1   :  { %15 = vsyncpa [#allocation8], 0 }
   0x2   :  { %16 = vsyncpa [#allocation6], 0  ;;  %s604_s27 = smov [#allocation4]   ;;  %s605_s29 = smov [#allocation7]  }
   0x3   :  { %s23_s28 = sshll.u32 %s604_s27, 4  ;;  %s41_s30 = sshll.u32 %s605_s29, 4  ;;  %s24_s28 = int_to_ptr.vmem [resolvable:$true] %s23_s28  ;;  %s42_s30 = int_to_ptr.vmem [resolvable:$true] %s41_s30 }
   0x4   :  { %s532_s11 = scalar_lea.hbm %s766_s0, 128 }
   0x5   :  { %p533_p0 = scmp.ne.s32.totalorder %s766_s0, %s532_s11  ;;  %p536_p1 = scmp.lt.u32.totalorder %s532_s11, %s766_s0 }
   0x7   :  { %p538_p2 = pnand %p536_p1, %p533_p0 }
   0x9   :  { %541 = shalt.err (!%p538_p2)
}
   0xa   :  { %s542_s16 = scalar_lea.vmem %s24_s28, 128  ;;  %p547_p4 = scmp.lt.s32.totalorder %s24_s28, %s24_s28 }
   0xb   :  { %p543_p3 = scmp.ne.s32.totalorder %s24_s28, %s542_s16  ;;  %p548_p5 = scmp.lt.s32.totalorder %s542_s16, %s542_s16 }
   0xd   :  { %p549_p6 = por %p548_p5, %p547_p4 }
   0xf   :  { %p550_p7 = pnand %p549_p6, %p543_p3 }
  0x11   :  { %553 = shalt.err (!%p550_p7)
}
  0x12   :  { %26 = dma.hbm_to_vmem [thread:$0]  %s766_s0, 128, %s24_s28, [#allocation5]  }
  0x13   :  { %s554_s21 = scalar_lea.hbm %s771_s5, 128 }
  0x14   :  { %p555_p8 = scmp.ne.s32.totalorder %s771_s5, %s554_s21  ;;  %p558_p9 = scmp.lt.u32.totalorder %s554_s21, %s771_s5 }
  0x16   :  { %p560_p10 = pnand %p558_p9, %p555_p8 }
  0x18   :  { %563 = shalt.err (!%p560_p10)
}
  0x19   :  { %s564_s26 = scalar_lea.vmem %s42_s30, 128  ;;  %p569_p12 = scmp.lt.s32.totalorder %s42_s30, %s42_s30 }
  0x1a   :  { %p565_p11 = scmp.ne.s32.totalorder %s42_s30, %s564_s26  ;;  %p570_p13 = scmp.lt.s32.totalorder %s564_s26, %s564_s26 }
  0x1c   :  { %p571_p0 = por %p570_p13, %p569_p12 }
  0x1e   :  { %p572_p1 = pnand %p571_p0, %p565_p11 }
  0x20   :  { %575 = shalt.err (!%p572_p1)
}
  0x21   :  { %44 = dma.hbm_to_vmem [thread:$0]  %s771_s5, 128, %s42_s30, [#allocation8]  }
  0x22   :  { %598 = dma.done.wait [#allocation5], 128  }
  0x23   :  { %599 = vsyncadd [#allocation5], 4294967168 }
  0x24   :  { %600 = dma.done.wait [#allocation8], 128  }
  0x25   :  { %601 = vsyncadd [#allocation8], 4294967168  ;;  %v606_v0 = vmov 0.0   ;;  %vm607_vm0 = vmmov 0   ;;  %vm159_vm1 = vcmask 1041408   ;;  %v56_v2 = vld [vmem:[%s767_s1] sm:$0xff] }
  0x26   :  { %480 = vmatprep.subr.bf16.mxu1 %v606_v0  ;;  %482 = vmatprep.mubr.msk.bf16.mxu1 %vm607_vm0, %v606_v0  ;;  %v206_v1 = vld [vmem:[%s770_s4] sm:$0x3]  ;;  %v699_v4 = vpack.c.bf16 %v56_v2, %v56_v2  ;;  %vm207_vm2 = vcmask 31744   ;;  %v708_v6 = vld [vmem:[#allocation4] sm:$0xff]  ;;  %vm260_vm3 = vcmask 130048   ;;  %vm310_vm4 = vcmask 261120  }
  0x27   :  { %466 = vmatprep.subr.bf16.mxu0 %v606_v0  ;;  %476 = vmatprep.mubr.msk.bf16.mxu0 %vm607_vm0, %v606_v0  ;;  %v212_v3 = vsel %vm159_vm1, %v206_v1, 0  ;;  %v518_v5 = vld [vmem:[%s769_s3] sm:$0xff]   ;;  %v203_v7 = vpack.c.bf16 %v708_v6, %v708_v6  ;;  %v443_v13 = vld [vmem:[#allocation7] ss:$0 sm:$0xff]  ;;  %v608_v20 = vmov 1   ;;  %v609_v21 = vmov 3  }
  0x28   :  { %481 = vmatpush3.bf16.msra.mxu1 %v212_v3  ;;  %513 = vset.pattern.permute.xlu1 %v608_v20  ;;  %v610_v22 = vmov 2   ;;  %v519_v28 = vld [vmem:[%s772_s6] sm:$0xff]   ;;  %v520_v29 = vld [vmem:[%s772_s6 + $0x8] sm:$0xff]   ;;  %v611_v31 = vmov 0   ;;  %s612_s12 = smov 16   ;;  %s613_s6 = smov 32   ;;  %v344_v1 = vstv %s773_s7 }
  0x29   :  { %486 = vmatprep.subr.bf16.mxu1 %v606_v0  ;;  %515 = vset.pattern.permute.xlu0 %v609_v21  ;;  %v521_v37 = vld [vmem:[%s768_s2] sm:$0xff]   ;;  %v522_v38 = vld [vmem:[%s768_s2 + $0x8] sm:$0xff]   ;;  %v523_v40 = vld [vmem:[%s768_s2 + $0x10] sm:$0xff]   ;;  %s614_s23 = smov 48   ;;  %s615_s24 = smov 64   ;;  %vm65_vm5 = vcmask 125952  }
  0x2a   :  { %68 = vperm.xlu1 %513, %v56_v2   ;;  %467 = vmatpush3.bf16.msra.mxu0 %v521_v37  ;;  %v524_v43 = vld [vmem:[%s768_s2 + $0x18] sm:$0xff]   ;;  %v525_v44 = vld [vmem:[%s768_s2 + $0x20] ss:$0 sps:$4 sm:$0x33]   ;;  %v444_v50 = vld [vmem:[#allocation7 + $0x1] ss:$0 sm:$0xff] }
  0x2b   :  { %483 = vmatmul.mubr.msk.bf16.vlgmr.msra.gmra.mrb[0].mxu1 %vm207_vm2, %v699_v4  ;;  %468 = vmatprep.subr.bf16.mxu0 %v606_v0  ;;  %v161_v45 = vsel %vm159_vm1, %v525_v44, 0  ;;  %v445_v52 = vld [vmem:[#allocation7 + $0x2] ss:$0 sm:$0xff]  ;;  %vm79_vm6 = vcmask 257152   ;;  %vm93_vm7 = vcmask 388352   ;;  %vm107_vm8 = vcmask 519552  }
  0x2c   :  { %487 = vmatpush3.bf16.msra.mxu1 %v518_v5  ;;  %488 = vmatprep.mubr.msk.bf16.mxu1 %vm607_vm0, %v606_v0  ;;  %vm116_vm9 = vcmask 552448   ;;  %vm155_vm10 = vcmask 556032   ;;  %s616_s26 = smov [#allocation9]  }
  0x2d   :  { %492 = vmatprep.subr.bf16.mxu1 %v606_v0  ;;  %s420_s7 = sshll.u32 %s616_s26, 4  ;;  %s421_s7 = int_to_ptr.vmem [resolvable:$true] %s420_s7 }
  0x2e   :  { %514 = vset.pattern.permute.xlu1 %v610_v22  ;;  %469 = vmatpush3.bf16.msra.mxu0 %v522_v38  ;;  %s576_s0 = scalar_lea.vmem %s421_s7, 128  ;;  %p581_p3 = scmp.lt.s32.totalorder %s421_s7, %s421_s7 }
  0x2f   :  { %82 = vperm.xlu1 %514, %v56_v2   ;;  %470 = vmatprep.subr.bf16.mxu0 %v606_v0  ;;  %p577_p2 = scmp.ne.s32.totalorder %s421_s7, %s576_s0  ;;  %p582_p4 = scmp.lt.s32.totalorder %s576_s0, %s576_s0 }
  0x31   :  { %p583_p5 = por %p582_p4, %p581_p3 }
  0x32   :  { %471 = vmatpush3.bf16.msra.mxu0 %v523_v40 }
  0x33   :  { %489 = vmatmul.mubr.msk.bf16.vlgmr.msra.gmra.mrb[4].mxu1 %vm260_vm3, %v203_v7  ;;  %516 = vset.pattern.permute.xlu1 %v611_v31  ;;  %p584_p6 = pnand %p583_p5, %p577_p2 }
  0x34   :  { %496 = vmatprep.mubr.msk.bf16.mxu1 %vm607_vm0, %v606_v0  ;;  %493 = vmatpush3.bf16.msra.mxu1 %v519_v28 }
  0x35   :  { %494 = vmatprep.subr.bf16.mxu1 %v606_v0  ;;  %60 = vperm.xlu1 %516, %v56_v2  }
  0x36   :  { %472 = vmatprep.subr.bf16.mxu0 %v606_v0 }
  0x37   :  { %473 = vmatpush3.bf16.msra.mxu0 %v524_v43 }
  0x38   :  { %495 = vmatpush3.bf16.msra.mxu1 %v520_v29  ;;  %474 = vmatprep.subr.bf16.mxu0 %v606_v0 }
  0x3b   :  { %475 = vmatpush3.bf16.msra.mxu0 %v161_v45 }
  0xa9   :  { %v69_v30 = vpop.permute.xlu1 %68 }
  0xaa   :  { %v71_v32 = vmul.f32 %v69_v30, %v708_v6 }
  0xac   :  { %v449_v33 = vpack.c.bf16 %v71_v32, %v71_v32 }
  0xae   :  { %v83_v34 = vpop.permute.xlu1 %82  ;;  %76 = vrot.lane.b32.xlu1 %v449_v33, %s612_s12 }
  0xaf   :  { %v85_v35 = vmul.f32 %v83_v34, %v708_v6 }
  0xb1   :  { %v450_v36 = vpack.c.bf16 %v85_v35, %v85_v35 }
  0xb3   :  { %90 = vrot.lane.b32.xlu1 %v450_v36, %s613_s6 }
  0xb4   :  { %v61_v57 = vpop.permute.xlu1 %60 }
  0xb5   :  { %v63_v58 = vmul.f32 %v61_v57, %v708_v6 }
  0xb7   :  { %v64_v59 = vpack.c.bf16 %v63_v58, %v63_v58 }
  0xb9   :  { %66 = vst.msk [vmem:[#allocation2] sm:$0xf] %vm65_vm5, %v64_v59 }
  0xfe   :  { %v248_v8 = vpop.f32.mrb[0].mxu1 }
  0xff   :  { %v484_v9 = vpop.f32.mrb[1].mxu1 }
 0x100   :  { %v251_v10 = vpop.f32.mrb[2].mxu1 }
 0x101   :  { %v485_v11 = vpop.f32.mrb[3].mxu1 }
 0x106   :  { %v298_v12 = vpop.f32.mrb[4].mxu1 }
 0x107   :  { %v299_v14 = vadd.f32 %v298_v12, %v248_v8  ;;  %v490_v15 = vpop.f32.mrb[5].mxu1 }
 0x108   :  { %v301_v16 = vpop.f32.mrb[6].mxu1 }
 0x109   :  { %v491_v17 = vpop.f32.mrb[7].mxu1  ;;  %v309_v18 = vadd.f32 %v443_v13, %v299_v14 }
 0x10b   :  { %v311_v19 = vsel %vm310_vm4, %v309_v18, 0.0 }
 0x10c   :  { %312 = vadd.xlane.f32.xlu0 %v311_v19 }
 0x120   :  { %v77_v60 = vpop.permute.xlu1 %76 }
 0x121   :  { %80 = vst.msk [vmem:[#allocation2] sm:$0xf] %vm79_vm6, %v77_v60 }
 0x125   :  { %v91_v61 = vpop.permute.xlu1 %90 }
 0x126   :  { %94 = vst.msk [vmem:[#allocation2] sm:$0xf] %vm93_vm7, %v91_v61 }
 0x199   :  { %v313_v23 = vpop.xlane.xlu0 %312 }
 0x19a   :  { %v315_v24 = vmul.f32 0.03125, %v313_v23 }
 0x19c   :  { %v316_v25 = vsub.f32 %v309_v18, %v315_v24 }
 0x19e   :  { %v317_v26 = vmul.f32 %v316_v25, %v316_v25 }
 0x1a0   :  { %v318_v27 = vsel %vm310_vm4, %v317_v26, 0.0 }
 0x1a1   :  { %319 = vadd.xlane.f32.xlu0 %v318_v27 }
 0x1b7   :  { %96 = vperm.xlu0 %515, %v56_v2  }
 0x1bb   :  { %517 = vset.pattern.permute.xlu0 %v611_v31 }
 0x22e   :  { %v320_v39 = vpop.xlane.xlu0 %319 }
 0x22f   :  { %v321_v41 = vmul.f32 0.03125, %v320_v39 }
 0x231   :  { %v322_v42 = vadd.f32 1e-05, %v321_v41 }
 0x233   :  { %526 = vrsqrt.f32 %v322_v42 }
 0x236   :  { %v97_v46 = vpop.permute.xlu0 %96 }
 0x237   :  { %v99_v47 = vmul.f32 %v97_v46, %v708_v6 }
 0x239   :  { %v451_v48 = vpack.c.bf16 %v99_v47, %v99_v47 }
 0x23b   :  { %104 = vrot.lane.b32.xlu1 %v451_v48, %s614_s23 }
 0x23d   :  { %v527_v49 = vpop.eup %526 }
 0x23e   :  { %v324_v51 = vmul.f32 %v527_v49, %v316_v25 }
 0x23f   :  { %113 = vrot.lane.b32.xlu1 %v699_v4, %s615_s24 }
 0x240   :  { %v330_v53 = vmul.f32 %v444_v50, %v324_v51 }
 0x242   :  { %v336_v54 = vadd.f32 %v445_v52, %v330_v53 }
 0x244   :  { %v337_v55 = vmax.f32 %v336_v54, 0.0 }
 0x246   :  { %v338_v56 = vpack.c.bf16 %v337_v55, %v337_v55 }
 0x248   :  { %497 = vmatmul.mubr.msk.bf16.vlgmr.msra.gmra.mrb[8].mxu1 %vm310_vm4, %v338_v56 }
 0x2ad   :  { %v105_v62 = vpop.permute.xlu1 %104 }
 0x2ae   :  { %108 = vst.msk [vmem:[#allocation2] sm:$0xf] %vm107_vm8, %v105_v62 }
 0x2b1   :  { %v114_v63 = vpop.permute.xlu1 %113 }
 0x2b2   :  { %117 = vst.msk [vmem:[#allocation2] sm:$0xf] %vm116_vm9, %v114_v63 }
 0x2b9   :  { %v118_v0 = vld [vmem:[#allocation2] sm:$0xf] }
 0x2ba   :  { %477 = vmatmul.mubr.msk.bf16.vlgmr.msra.gmra.mrb[0].mxu0 %vm155_vm10, %v118_v0 }
 0x31b   :  { %v394_v2 = vpop.f32.mrb[8].mxu1 }
 0x31c   :  { %v395_v3 = vadd.f32 %v394_v2, %v344_v1  ;;  %v498_v4 = vpop.f32.mrb[9].mxu1 }
 0x31d   :  { %v397_v5 = vpop.f32.mrb[10].mxu1 }
 0x31e   :  { %v400_v7 = vsub.f32 0.0, %v395_v3  ;;  %v499_v8 = vpop.f32.mrb[11].mxu1 }
 0x320   :  { %v401_v9 = vmul.f32 1.442695, %v400_v7 }
 0x322   :  { %528 = vpow2.f32 %v401_v9 }
 0x32c   :  { %v529_v10 = vpop.eup %528 }
 0x32d   :  { %v403_v11 = vadd.f32 1.0, %v529_v10 }
 0x32f   :  { %530 = vrcp.f32 %v403_v11 }
 0x339   :  { %v531_v12 = vpop.eup %530 }
 0x33a   :  { %407 = vperm.xlu1 %516, %v531_v12  }
 0x38d   :  { %v197_v13 = vpop.f32.mrb[0].mxu0 }
 0x38e   :  { %v478_v14 = vpop.f32.mrb[1].mxu0 }
 0x38f   :  { %v200_v15 = vpop.f32.mrb[2].mxu0 }
 0x390   :  { %v479_v16 = vpop.f32.mrb[3].mxu0 }
 0x3b9   :  { %v408_v17 = vpop.permute.xlu1 %407 }
 0x3ba   :  { %v410_v18 = vmul.f32 %v408_v17, %v197_v13 }
 0x3bc   :  { %v412_v19 = vadd.f32 %v410_v18, %v708_v6 }
 0x3be   :  { %413 = vst [vmem:[#allocation9] sm:$0xff] %v412_v19 }
 0x3bf   :  { %587 = shalt.err (!%p584_p6)
}
 0x3c0   :  { %s588_s29 = scalar_lea.hbm %s774_s8, 128 }
 0x3c1   :  { %p589_p7 = scmp.ne.s32.totalorder %s774_s8, %s588_s29  ;;  %p592_p8 = scmp.lt.u32.totalorder %s588_s29, %s774_s8 }
 0x3c3   :  { %p594_p9 = pnand %p592_p8, %p589_p7 }
 0x3c5   :  { %597 = shalt.err (!%p594_p9)
}
 0x3c6   :  { %423 = dma.vmem_to_hbm [thread:$0]  %s421_s7, 128, %s774_s8, [#allocation6]  }
 0x3c7   :  { %602 = dma.done.wait [#allocation6], 128  }
 0x3c8   :  { %603 = vsyncadd [#allocation6], 4294967168 }
 0x3c9   :  { %427 = vsyncpa [#allocation5], 1 }
 0x3ca   :  { %428 = vsyncpa [#allocation8], 1 }
 0x3cb   :  { %429 = vsyncpa [#allocation6], 1 }

</bundles_post_ra>
